<compile_context>
chip_gen: v5e
topology: v5e:2x2
jax: 0.10.0
libtpu: 0.0.40
codegen_flags: <defaults>
</compile_context>

<pallas_src>
import functools

import jax
import jax.numpy as jnp
from jax.experimental import pallas as pl
from jax.experimental.pallas import tpu as pltpu

EPS = 1e-5


# --------------------------------------------------------------------------- kernel
def _resblock_kernel(x_ref, wb1_ref, wb2_ref, g_ref, gb_ref, out_ref, *, n, h, w, c):
    """Fused ResBlock: relu(bn2(conv2(relu(bn1(conv1(x))))) + x), all VMEM-resident.

    x_ref  : (N*H, W*C)    lane-packed activations (lane = w*C + c)
    wb*_ref: (3*W*C, W*C)  banded conv weights (one band per kernel row dh, stacked)
    g_ref  : (W*C, W*C)    channel-sum matrix  G[w*C+c, w'*C+c'] = (c == c')
    gb_ref : (4, W*C)      lane-tiled (gamma1, beta1, gamma2, beta2)
    out_ref: (N*H, W*C)
    """
    wc = w * c
    inv_m = 1.0 / float(n * h * w)
    g_mat = g_ref[...]

    def conv3x3(act, wb):
        # One batched MXU matmul per conv: (N*H, 3*W*C) @ (3*W*C, W*C).
        # Row shifts (with zero rows at per-image boundaries) give the H "same"
        # padding; the W "same" padding is built into the banded weights.
        a3 = act.reshape(n, h, wc)                                   # free (leading split)
        zrow = jnp.zeros((n, 1, wc), act.dtype)
        prev = jnp.concatenate([zrow, a3[:, :h - 1, :]], axis=1)     # reads x[i-1]
        nxt = jnp.concatenate([a3[:, 1:, :], zrow], axis=1)          # reads x[i+1]
        lhs = jnp.concatenate([prev, a3, nxt], axis=-1).reshape(n * h, 3 * wc)
        return jnp.dot(lhs, wb, preferred_element_type=jnp.float32)

    def bn_relu(y, gamma_l, beta_l, residual=None):
        # Training-mode BatchNorm (biased variance), two-pass for stability; the
        # per-channel reduce across the lane-packed W positions is a matmul with G,
        # so all statistics stay lane-tiled (1, W*C).
        mean_l = jnp.sum(jnp.dot(y, g_mat, preferred_element_type=jnp.float32),
                         axis=0, keepdims=True) * inv_m
        cen = y - mean_l
        var_l = jnp.sum(jnp.dot(cen * cen, g_mat, preferred_element_type=jnp.float32),
                        axis=0, keepdims=True) * inv_m
        scale_l = gamma_l * jax.lax.rsqrt(var_l + EPS)
        out = cen * scale_l + beta_l
        if residual is not None:
            out = out + residual
        return jnp.maximum(out, 0.0)

    x = x_ref[...]
    h1 = bn_relu(conv3x3(x, wb1_ref[...]), gb_ref[0:1, :], gb_ref[1:2, :])
    y = bn_relu(conv3x3(h1, wb2_ref[...]), gb_ref[2:3, :], gb_ref[3:4, :], residual=x)
    # Single 8 KiB store; 64-lane width (< 128) is the only remaining partial-lane
    # store and is negligible once everything else is fused/VMEM-resident.
    out_ref[...] = y


# --------------------------------------------------------------------------- wrappers
def _banded_weights(w_hwio, width):
    """HWIO (3, 3, Cin, Cout) -> (3*W*Cin, W*Cout) stacked block-tridiagonal bands.

    Band dh maps the lane-packed input row x[h+dh-1] (lane = w_in*Cin + ci) directly
    to the lane-packed output row (lane = w_out*Cout + co); the 'same' W padding is
    structural (out-of-range dw blocks are simply absent), so no spatial padding is
    ever materialized.  Sized for small C.
    # TODO(synk): for C beyond ~16-32 switch to an im2col (tile_m, 9*C) @ (9*C, C)
    # formulation -- the band matrix grows as (W*C)^2 and wastes MXU FLOPs on zeros.
    """
    kh, kw, cin, cout = w_hwio.shape
    bands = []
    for dh in range(kh):
        band = jnp.zeros((width * cin, width * cout), jnp.float32)
        for dw in range(kw):
            shift = jnp.eye(width, k=1 - dw, dtype=jnp.float32)   # w_in = w_out + dw - 1
            band = band + jnp.kron(shift, w_hwio[dh, dw].astype(jnp.float32))
        bands.append(band)
    return jnp.concatenate(bands, axis=0)


def resblock_forward(x_nchw, params):
    """ResBlock forward. x_nchw: (N, C, H, W) float32, same as the PyTorch module."""
    n, c, h, w = x_nchw.shape
    wc = w * c
    x_flat = jnp.transpose(x_nchw, (0, 2, 3, 1)).reshape(n * h, wc)   # lane-packed NHWC

    wb1 = _banded_weights(params["w1"], w)
    wb2 = _banded_weights(params["w2"], w)
    g_mat = jnp.tile(jnp.eye(c, dtype=jnp.float32), (w, w))           # channel-sum matrix
    gb = jnp.stack([jnp.tile(params["g1"].reshape(-1), w),
                    jnp.tile(params["be1"].reshape(-1), w),
                    jnp.tile(params["g2"].reshape(-1), w),
                    jnp.tile(params["be2"].reshape(-1), w)]).astype(jnp.float32)
    # Conv biases b1/b2 are intentionally unused on the kernel path: training-mode
    # BatchNorm subtracts the batch mean, which cancels a per-channel constant exactly.

    kernel = functools.partial(_resblock_kernel, n=n, h=h, w=w, c=c)
    # TODO(synk): for large N*H*W*C (working set beyond ~16 MiB on v7x's 64 MiB VMEM)
    # tile the row dimension with a grid and accumulate BN statistics across steps.
    y_flat = pl.pallas_call(
        kernel,
        grid=(1,),
        in_specs=[
            pl.BlockSpec((n * h, wc), lambda i: (0, 0)),
            pl.BlockSpec((3 * wc, wc), lambda i: (0, 0)),
            pl.BlockSpec((3 * wc, wc), lambda i: (0, 0)),
            pl.BlockSpec((wc, wc), lambda i: (0, 0)),
            pl.BlockSpec((4, wc), lambda i: (0, 0)),
        ],
        out_specs=pl.BlockSpec((n * h, wc), lambda i: (0, 0)),
        out_shape=jax.ShapeDtypeStruct((n * h, wc), jnp.float32),
        compiler_params=pltpu.CompilerParams(
            dimension_semantics=("arbitrary",),
            vmem_limit_bytes=32 * 1024 * 1024),
    )(x_flat, wb1, wb2, g_mat, gb)

    return jnp.transpose(y_flat.reshape(n, h, w, c), (0, 3, 1, 2))


# --------------------------------------------------------------------------- reference
def resblock_ref(x_nchw, params):
    """Pure-JAX reference matching the PyTorch forward (training-mode BN)."""
    x = jnp.transpose(x_nchw, (0, 2, 3, 1))

    def conv(hh, w_hwio, b):
        out = jax.lax.conv_general_dilated(
            hh, w_hwio, (1, 1), "SAME",
            dimension_numbers=("NHWC", "HWIO", "NHWC"))
        return out + b.reshape(1, 1, 1, -1)

    def bn(hh, g, be):
        mean = jnp.mean(hh, axis=(0, 1, 2), keepdims=True)
        var = jnp.var(hh, axis=(0, 1, 2), keepdims=True)
        return (hh - mean) * jax.lax.rsqrt(var + EPS) * g.reshape(1, 1, 1, -1) \
            + be.reshape(1, 1, 1, -1)

    hmid = jax.nn.relu(bn(conv(x, params["w1"], params["b1"]), params["g1"], params["be1"]))
    y = jax.nn.relu(bn(conv(hmid, params["w2"], params["b2"]), params["g2"], params["be2"]) + x)
    return jnp.transpose(y, (0, 3, 1, 2))


if __name__ == "__main__":
    N, C, H, W = 2, 4, 16, 16
    key = jax.random.PRNGKey(0)
    ks = jax.random.split(key, 9)

    x = jax.random.normal(ks[0], (N, C, H, W), jnp.float32)
    # Deterministic synthetic parameters (shapes from nn.Conv2d / nn.BatchNorm2d).
    # Conv weights stored directly in HWIO = PyTorch OIHW transposed (2, 3, 1, 0).
    params = dict(
        w1=0.1 * jax.random.normal(ks[1], (3, 3, C, C), jnp.float32),
        b1=0.1 * jax.random.normal(ks[2], (1, C), jnp.float32),
        g1=1.0 + 0.1 * jax.random.normal(ks[3], (1, C), jnp.float32),
        be1=0.1 * jax.random.normal(ks[4], (1, C), jnp.float32),
        w2=0.1 * jax.random.normal(ks[5], (3, 3, C, C), jnp.float32),
        b2=0.1 * jax.random.normal(ks[6], (1, C), jnp.float32),
        g2=1.0 + 0.1 * jax.random.normal(ks[7], (1, C), jnp.float32),
        be2=0.1 * jax.random.normal(ks[8], (1, C), jnp.float32),
    )

    out = jax.jit(resblock_forward)(x, params)
    out = jax.block_until_ready(out)

    ref = resblock_ref(x, params)
    assert out.shape == x.shape and out.dtype == x.dtype
    err = float(jnp.max(jnp.abs(out - ref)))
    if err > 5e-4:
        raise AssertionError(f"mismatch vs reference: max abs err {err}")
    print("KERNEL_OK")
</pallas_src>

<mosaic_0001>
module attributes {stable_mosaic.version = 11 : i64} {
  func.func @_resblock_kernel(%arg0: i32, %arg1: memref<32x64xf32, #tpu.memory_space<vmem>>, %arg2: memref<192x64xf32, #tpu.memory_space<vmem>>, %arg3: memref<192x64xf32, #tpu.memory_space<vmem>>, %arg4: memref<64x64xf32, #tpu.memory_space<vmem>>, %arg5: memref<4x64xf32, #tpu.memory_space<vmem>>, %arg6: memref<32x64xf32, #tpu.memory_space<vmem>>) attributes {dimension_semantics = [#tpu.dimension_semantics<arbitrary>], iteration_bounds = array<i64: 1>, scalar_prefetch = 0 : i64, scratch_operands = 0 : i64, tpu.core_type = #tpu.core_type<tc>, window_params = [{pipeline_mode = #tpu.pipeline_mode<synchronous>, transform_indices = @transform_0, window_bounds = array<i64: 32, 64>}, {pipeline_mode = #tpu.pipeline_mode<synchronous>, transform_indices = @transform_1, window_bounds = array<i64: 192, 64>}, {pipeline_mode = #tpu.pipeline_mode<synchronous>, transform_indices = @transform_2, window_bounds = array<i64: 192, 64>}, {pipeline_mode = #tpu.pipeline_mode<synchronous>, transform_indices = @transform_3, window_bounds = array<i64: 64, 64>}, {pipeline_mode = #tpu.pipeline_mode<synchronous>, transform_indices = @transform_4, window_bounds = array<i64: 4, 64>}, {pipeline_mode = #tpu.pipeline_mode<synchronous>, transform_indices = @transform_5, window_bounds = array<i64: 32, 64>}]} {
    %c0 = arith.constant 0 : index
    %c0_0 = arith.constant 0 : index
    %0 = vector.load %arg4[%c0, %c0_0] : memref<64x64xf32, #tpu.memory_space<vmem>>, vector<64x64xf32>
    %c0_1 = arith.constant 0 : index
    %c0_2 = arith.constant 0 : index
    %1 = vector.load %arg1[%c0_1, %c0_2] : memref<32x64xf32, #tpu.memory_space<vmem>>, vector<32x64xf32>
    %c0_3 = arith.constant 0 : index
    %c0_4 = arith.constant 0 : index
    %2 = vector.load %arg2[%c0_3, %c0_4] : memref<192x64xf32, #tpu.memory_space<vmem>>, vector<192x64xf32>
    %3 = vector.shape_cast %1 : vector<32x64xf32> to vector<2x16x64xf32>
    %cst = arith.constant 0.000000e+00 : f32
    %4 = vector.broadcast %cst : f32 to vector<2x1x64xf32>
    %5 = vector.extract_strided_slice %3 {offsets = [0, 0, 0], sizes = [2, 15, 64], strides = [1, 1, 1]} : vector<2x16x64xf32> to vector<2x15x64xf32>
    %6 = tpu.concatenate %4, %5 in 1 : vector<2x1x64xf32>, vector<2x15x64xf32> -> vector<2x16x64xf32>
    %7 = vector.extract_strided_slice %3 {offsets = [0, 1, 0], sizes = [2, 15, 64], strides = [1, 1, 1]} : vector<2x16x64xf32> to vector<2x15x64xf32>
    %8 = tpu.concatenate %7, %4 in 1 : vector<2x15x64xf32>, vector<2x1x64xf32> -> vector<2x16x64xf32>
    %9 = tpu.concatenate %6, %3, %8 in 2 : vector<2x16x64xf32>, vector<2x16x64xf32>, vector<2x16x64xf32> -> vector<2x16x192xf32>
    %10 = vector.shape_cast %9 : vector<2x16x192xf32> to vector<32x192xf32>
    %cst_5 = arith.constant dense<0.000000e+00> : vector<32x64xf32>
    %11 = tpu.matmul %10, %2, %cst_5 {dimension_numbers = #tpu.dot_dimension_numbers<[1], [0], [0], [1], [0, 0, 1, 1], [], []>} : vector<32x192xf32>, vector<192x64xf32>, vector<32x64xf32> -> vector<32x64xf32>
    %c0_6 = arith.constant 0 : index
    %c0_7 = arith.constant 0 : index
    %12 = vector.load %arg5[%c0_6, %c0_7] : memref<4x64xf32, #tpu.memory_space<vmem>>, vector<1x64xf32>
    %c1 = arith.constant 1 : index
    %c0_8 = arith.constant 0 : index
    %13 = vector.load %arg5[%c1, %c0_8] : memref<4x64xf32, #tpu.memory_space<vmem>>, vector<1x64xf32>
    %cst_9 = arith.constant dense<0.000000e+00> : vector<32x64xf32>
    %14 = tpu.matmul %11, %0, %cst_9 {dimension_numbers = #tpu.dot_dimension_numbers<[1], [0], [0], [1], [0, 0, 1, 1], [], []>} : vector<32x64xf32>, vector<64x64xf32>, vector<32x64xf32> -> vector<32x64xf32>
    %cst_10 = arith.constant dense<0.000000e+00> : vector<64xf32>
    %15 = vector.multi_reduction <add>, %14, %cst_10 [0] : vector<32x64xf32> to vector<64xf32>
    %16 = vector.shape_cast %15 : vector<64xf32> to vector<1x64xf32>
    %cst_11 = arith.constant 0.001953125 : f32
    %17 = vector.broadcast %cst_11 : f32 to vector<1x64xf32>
    %18 = arith.mulf %16, %17 : vector<1x64xf32>
    %19 = vector.broadcast %18 : vector<1x64xf32> to vector<32x64xf32>
    %20 = arith.subf %11, %19 : vector<32x64xf32>
    %21 = arith.mulf %20, %20 : vector<32x64xf32>
    %cst_12 = arith.constant dense<0.000000e+00> : vector<32x64xf32>
    %22 = tpu.matmul %21, %0, %cst_12 {dimension_numbers = #tpu.dot_dimension_numbers<[1], [0], [0], [1], [0, 0, 1, 1], [], []>} : vector<32x64xf32>, vector<64x64xf32>, vector<32x64xf32> -> vector<32x64xf32>
    %cst_13 = arith.constant dense<0.000000e+00> : vector<64xf32>
    %23 = vector.multi_reduction <add>, %22, %cst_13 [0] : vector<32x64xf32> to vector<64xf32>
    %24 = vector.shape_cast %23 : vector<64xf32> to vector<1x64xf32>
    %cst_14 = arith.constant 0.001953125 : f32
    %25 = vector.broadcast %cst_14 : f32 to vector<1x64xf32>
    %26 = arith.mulf %24, %25 : vector<1x64xf32>
    %cst_15 = arith.constant 9.99999974E-6 : f32
    %27 = vector.broadcast %cst_15 : f32 to vector<1x64xf32>
    %28 = arith.addf %26, %27 : vector<1x64xf32>
    %29 = math.rsqrt %28 : vector<1x64xf32>
    %30 = arith.mulf %12, %29 : vector<1x64xf32>
    %31 = vector.broadcast %30 : vector<1x64xf32> to vector<32x64xf32>
    %32 = arith.mulf %20, %31 : vector<32x64xf32>
    %33 = vector.broadcast %13 : vector<1x64xf32> to vector<32x64xf32>
    %34 = arith.addf %32, %33 : vector<32x64xf32>
    %cst_16 = arith.constant 0.000000e+00 : f32
    %35 = vector.broadcast %cst_16 : f32 to vector<32x64xf32>
    %36 = arith.maximumf %34, %35 : vector<32x64xf32>
    %c0_17 = arith.constant 0 : index
    %c0_18 = arith.constant 0 : index
    %37 = vector.load %arg3[%c0_17, %c0_18] : memref<192x64xf32, #tpu.memory_space<vmem>>, vector<192x64xf32>
    %38 = vector.shape_cast %36 : vector<32x64xf32> to vector<2x16x64xf32>
    %cst_19 = arith.constant 0.000000e+00 : f32
    %39 = vector.broadcast %cst_19 : f32 to vector<2x1x64xf32>
    %40 = vector.extract_strided_slice %38 {offsets = [0, 0, 0], sizes = [2, 15, 64], strides = [1, 1, 1]} : vector<2x16x64xf32> to vector<2x15x64xf32>
    %41 = tpu.concatenate %39, %40 in 1 : vector<2x1x64xf32>, vector<2x15x64xf32> -> vector<2x16x64xf32>
    %42 = vector.extract_strided_slice %38 {offsets = [0, 1, 0], sizes = [2, 15, 64], strides = [1, 1, 1]} : vector<2x16x64xf32> to vector<2x15x64xf32>
    %43 = tpu.concatenate %42, %39 in 1 : vector<2x15x64xf32>, vector<2x1x64xf32> -> vector<2x16x64xf32>
    %44 = tpu.concatenate %41, %38, %43 in 2 : vector<2x16x64xf32>, vector<2x16x64xf32>, vector<2x16x64xf32> -> vector<2x16x192xf32>
    %45 = vector.shape_cast %44 : vector<2x16x192xf32> to vector<32x192xf32>
    %cst_20 = arith.constant dense<0.000000e+00> : vector<32x64xf32>
    %46 = tpu.matmul %45, %37, %cst_20 {dimension_numbers = #tpu.dot_dimension_numbers<[1], [0], [0], [1], [0, 0, 1, 1], [], []>} : vector<32x192xf32>, vector<192x64xf32>, vector<32x64xf32> -> vector<32x64xf32>
    %c2 = arith.constant 2 : index
    %c0_21 = arith.constant 0 : index
    %47 = vector.load %arg5[%c2, %c0_21] : memref<4x64xf32, #tpu.memory_space<vmem>>, vector<1x64xf32>
    %c3 = arith.constant 3 : index
    %c0_22 = arith.constant 0 : index
    %48 = vector.load %arg5[%c3, %c0_22] : memref<4x64xf32, #tpu.memory_space<vmem>>, vector<1x64xf32>
    %cst_23 = arith.constant dense<0.000000e+00> : vector<32x64xf32>
    %49 = tpu.matmul %46, %0, %cst_23 {dimension_numbers = #tpu.dot_dimension_numbers<[1], [0], [0], [1], [0, 0, 1, 1], [], []>} : vector<32x64xf32>, vector<64x64xf32>, vector<32x64xf32> -> vector<32x64xf32>
    %cst_24 = arith.constant dense<0.000000e+00> : vector<64xf32>
    %50 = vector.multi_reduction <add>, %49, %cst_24 [0] : vector<32x64xf32> to vector<64xf32>
    %51 = vector.shape_cast %50 : vector<64xf32> to vector<1x64xf32>
    %cst_25 = arith.constant 0.001953125 : f32
    %52 = vector.broadcast %cst_25 : f32 to vector<1x64xf32>
    %53 = arith.mulf %51, %52 : vector<1x64xf32>
    %54 = vector.broadcast %53 : vector<1x64xf32> to vector<32x64xf32>
    %55 = arith.subf %46, %54 : vector<32x64xf32>
    %56 = arith.mulf %55, %55 : vector<32x64xf32>
    %cst_26 = arith.constant dense<0.000000e+00> : vector<32x64xf32>
    %57 = tpu.matmul %56, %0, %cst_26 {dimension_numbers = #tpu.dot_dimension_numbers<[1], [0], [0], [1], [0, 0, 1, 1], [], []>} : vector<32x64xf32>, vector<64x64xf32>, vector<32x64xf32> -> vector<32x64xf32>
    %cst_27 = arith.constant dense<0.000000e+00> : vector<64xf32>
    %58 = vector.multi_reduction <add>, %57, %cst_27 [0] : vector<32x64xf32> to vector<64xf32>
    %59 = vector.shape_cast %58 : vector<64xf32> to vector<1x64xf32>
    %cst_28 = arith.constant 0.001953125 : f32
    %60 = vector.broadcast %cst_28 : f32 to vector<1x64xf32>
    %61 = arith.mulf %59, %60 : vector<1x64xf32>
    %cst_29 = arith.constant 9.99999974E-6 : f32
    %62 = vector.broadcast %cst_29 : f32 to vector<1x64xf32>
    %63 = arith.addf %61, %62 : vector<1x64xf32>
    %64 = math.rsqrt %63 : vector<1x64xf32>
    %65 = arith.mulf %47, %64 : vector<1x64xf32>
    %66 = vector.broadcast %65 : vector<1x64xf32> to vector<32x64xf32>
    %67 = arith.mulf %55, %66 : vector<32x64xf32>
    %68 = vector.broadcast %48 : vector<1x64xf32> to vector<32x64xf32>
    %69 = arith.addf %67, %68 : vector<32x64xf32>
    %70 = arith.addf %69, %1 : vector<32x64xf32>
    %cst_30 = arith.constant 0.000000e+00 : f32
    %71 = vector.broadcast %cst_30 : f32 to vector<32x64xf32>
    %72 = arith.maximumf %70, %71 : vector<32x64xf32>
    %c0_31 = arith.constant 0 : index
    %c0_32 = arith.constant 0 : index
    %73 = vector.load %arg6[%c0_31, %c0_32] : memref<32x64xf32, #tpu.memory_space<vmem>>, vector<32x64xf32>
    tpu.vector_store %arg6[%c0_31, %c0_32], %72 {strides = array<i32>} : memref<32x64xf32, #tpu.memory_space<vmem>>, vector<32x64xf32>,
    return
  }
  func.func @transform_0(%arg0: i32) -> (i32, i32) {
    %c0_i32 = arith.constant 0 : i32
    %c0_i32_0 = arith.constant 0 : i32
    %c0_i32_1 = arith.constant 0 : i32
    return %c0_i32, %c0_i32_0 : i32, i32
  }
  func.func @transform_1(%arg0: i32) -> (i32, i32) {
    %c0_i32 = arith.constant 0 : i32
    %c0_i32_0 = arith.constant 0 : i32
    %c0_i32_1 = arith.constant 0 : i32
    return %c0_i32, %c0_i32_0 : i32, i32
  }
  func.func @transform_2(%arg0: i32) -> (i32, i32) {
    %c0_i32 = arith.constant 0 : i32
    %c0_i32_0 = arith.constant 0 : i32
    %c0_i32_1 = arith.constant 0 : i32
    return %c0_i32, %c0_i32_0 : i32, i32
  }
  func.func @transform_3(%arg0: i32) -> (i32, i32) {
    %c0_i32 = arith.constant 0 : i32
    %c0_i32_0 = arith.constant 0 : i32
    %c0_i32_1 = arith.constant 0 : i32
    return %c0_i32, %c0_i32_0 : i32, i32
  }
  func.func @transform_4(%arg0: i32) -> (i32, i32) {
    %c0_i32 = arith.constant 0 : i32
    %c0_i32_0 = arith.constant 0 : i32
    %c0_i32_1 = arith.constant 0 : i32
    return %c0_i32, %c0_i32_0 : i32, i32
  }
  func.func @transform_5(%arg0: i32) -> (i32, i32) {
    %c0_i32 = arith.constant 0 : i32
    %c0_i32_0 = arith.constant 0 : i32
    %c0_i32_1 = arith.constant 0 : i32
    return %c0_i32, %c0_i32_0 : i32, i32
  }
}

</mosaic_0001>

<bundles_post_ra>
// kernel: tile.24
= control target key start
LH: loop header
LB: loop body
LE: loop exit
PB: predicated region body
PF: predicated region fallthrough
CT: control target
= control target key end

     0   :  { %s938_s0 = inlined_call_operand.vmem [shape: f32[4,4], index: 0, kind: input, shape index: {}]   ;;  %s939_s1 = inlined_call_operand.vmem [shape: f32[16,4,16,4], index: 1, kind: output, shape index: {}]  }
   0x1   :  { %v409_v0 = vld [vmem:[%s938_s0] ss:$0 sm:$0xff]  ;;  %v470_v1 = vld [vmem:[%s938_s0 + $0x1] ss:$0 sm:$0xff]  ;;  %v539_v2 = vld [vmem:[%s938_s0 + $0x2] ss:$0 sm:$0xff] }
   0x2   :  { %5 = vst [vmem:[%s939_s1] sm:$0xff] %v409_v0  ;;  %v608_v3 = vld [vmem:[%s938_s0 + $0x3] ss:$0 sm:$0xff] }
   0x3   :  { %266 = vst [vmem:[%s939_s1 + $0x40] sm:$0xff] %v409_v0 }
   0x4   :  { %267 = vst [vmem:[%s939_s1 + $0x80] sm:$0xff] %v409_v0 }
   0x5   :  { %268 = vst [vmem:[%s939_s1 + $0xc0] sm:$0xff] %v409_v0 }
   0x6   :  { %269 = vst [vmem:[%s939_s1 + $0x100] sm:$0xff] %v409_v0 }
   0x7   :  { %270 = vst [vmem:[%s939_s1 + $0x140] sm:$0xff] %v409_v0 }
   0x8   :  { %271 = vst [vmem:[%s939_s1 + $0x180] sm:$0xff] %v409_v0 }
   0x9   :  { %272 = vst [vmem:[%s939_s1 + $0x1c0] sm:$0xff] %v409_v0 }
   0xa   :  { %273 = vst [vmem:[%s939_s1 + $0x200] sm:$0xff] %v409_v0 }
   0xb   :  { %274 = vst [vmem:[%s939_s1 + $0x240] sm:$0xff] %v409_v0 }
   0xc   :  { %275 = vst [vmem:[%s939_s1 + $0x280] sm:$0xff] %v409_v0 }
   0xd   :  { %276 = vst [vmem:[%s939_s1 + $0x2c0] sm:$0xff] %v409_v0 }
   0xe   :  { %277 = vst [vmem:[%s939_s1 + $0x300] sm:$0xff] %v409_v0 }
   0xf   :  { %278 = vst [vmem:[%s939_s1 + $0x340] sm:$0xff] %v409_v0 }
  0x10   :  { %279 = vst [vmem:[%s939_s1 + $0x380] sm:$0xff] %v409_v0 }
  0x11   :  { %280 = vst [vmem:[%s939_s1 + $0x3c0] sm:$0xff] %v409_v0 }
  0x12   :  { %282 = vst [vmem:[%s939_s1 + $0x10] sm:$0xff] %v470_v1 }
  0x13   :  { %283 = vst [vmem:[%s939_s1 + $0x50] sm:$0xff] %v470_v1 }
  0x14   :  { %284 = vst [vmem:[%s939_s1 + $0x90] sm:$0xff] %v470_v1 }
  0x15   :  { %285 = vst [vmem:[%s939_s1 + $0xd0] sm:$0xff] %v470_v1 }
  0x16   :  { %286 = vst [vmem:[%s939_s1 + $0x110] sm:$0xff] %v470_v1 }
  0x17   :  { %287 = vst [vmem:[%s939_s1 + $0x150] sm:$0xff] %v470_v1 }
  0x18   :  { %288 = vst [vmem:[%s939_s1 + $0x190] sm:$0xff] %v470_v1 }
  0x19   :  { %289 = vst [vmem:[%s939_s1 + $0x1d0] sm:$0xff] %v470_v1 }
  0x1a   :  { %290 = vst [vmem:[%s939_s1 + $0x210] sm:$0xff] %v470_v1 }
  0x1b   :  { %291 = vst [vmem:[%s939_s1 + $0x250] sm:$0xff] %v470_v1 }
  0x1c   :  { %292 = vst [vmem:[%s939_s1 + $0x290] sm:$0xff] %v470_v1 }
  0x1d   :  { %293 = vst [vmem:[%s939_s1 + $0x2d0] sm:$0xff] %v470_v1 }
  0x1e   :  { %294 = vst [vmem:[%s939_s1 + $0x310] sm:$0xff] %v470_v1 }
  0x1f   :  { %295 = vst [vmem:[%s939_s1 + $0x350] sm:$0xff] %v470_v1 }
  0x20   :  { %296 = vst [vmem:[%s939_s1 + $0x390] sm:$0xff] %v470_v1 }
  0x21   :  { %297 = vst [vmem:[%s939_s1 + $0x3d0] sm:$0xff] %v470_v1 }
  0x22   :  { %299 = vst [vmem:[%s939_s1 + $0x20] sm:$0xff] %v539_v2 }
  0x23   :  { %300 = vst [vmem:[%s939_s1 + $0x60] sm:$0xff] %v539_v2 }
  0x24   :  { %301 = vst [vmem:[%s939_s1 + $0xa0] sm:$0xff] %v539_v2 }
  0x25   :  { %302 = vst [vmem:[%s939_s1 + $0xe0] sm:$0xff] %v539_v2 }
  0x26   :  { %303 = vst [vmem:[%s939_s1 + $0x120] sm:$0xff] %v539_v2 }
  0x27   :  { %304 = vst [vmem:[%s939_s1 + $0x160] sm:$0xff] %v539_v2 }
  0x28   :  { %305 = vst [vmem:[%s939_s1 + $0x1a0] sm:$0xff] %v539_v2 }
  0x29   :  { %306 = vst [vmem:[%s939_s1 + $0x1e0] sm:$0xff] %v539_v2 }
  0x2a   :  { %307 = vst [vmem:[%s939_s1 + $0x220] sm:$0xff] %v539_v2 }
  0x2b   :  { %308 = vst [vmem:[%s939_s1 + $0x260] sm:$0xff] %v539_v2 }
  0x2c   :  { %309 = vst [vmem:[%s939_s1 + $0x2a0] sm:$0xff] %v539_v2 }
  0x2d   :  { %310 = vst [vmem:[%s939_s1 + $0x2e0] sm:$0xff] %v539_v2 }
  0x2e   :  { %311 = vst [vmem:[%s939_s1 + $0x320] sm:$0xff] %v539_v2 }
  0x2f   :  { %312 = vst [vmem:[%s939_s1 + $0x360] sm:$0xff] %v539_v2 }
  0x30   :  { %313 = vst [vmem:[%s939_s1 + $0x3a0] sm:$0xff] %v539_v2 }
  0x31   :  { %314 = vst [vmem:[%s939_s1 + $0x3e0] sm:$0xff] %v539_v2 }
  0x32   :  { %316 = vst [vmem:[%s939_s1 + $0x30] sm:$0xff] %v608_v3 }
  0x33   :  { %317 = vst [vmem:[%s939_s1 + $0x70] sm:$0xff] %v608_v3 }
  0x34   :  { %318 = vst [vmem:[%s939_s1 + $0xb0] sm:$0xff] %v608_v3 }
  0x35   :  { %319 = vst [vmem:[%s939_s1 + $0xf0] sm:$0xff] %v608_v3 }
  0x36   :  { %320 = vst [vmem:[%s939_s1 + $0x130] sm:$0xff] %v608_v3 }
  0x37   :  { %321 = vst [vmem:[%s939_s1 + $0x170] sm:$0xff] %v608_v3 }
  0x38   :  { %322 = vst [vmem:[%s939_s1 + $0x1b0] sm:$0xff] %v608_v3 }
  0x39   :  { %323 = vst [vmem:[%s939_s1 + $0x1f0] sm:$0xff] %v608_v3 }
  0x3a   :  { %324 = vst [vmem:[%s939_s1 + $0x230] sm:$0xff] %v608_v3 }
  0x3b   :  { %325 = vst [vmem:[%s939_s1 + $0x270] sm:$0xff] %v608_v3 }
  0x3c   :  { %326 = vst [vmem:[%s939_s1 + $0x2b0] sm:$0xff] %v608_v3 }
  0x3d   :  { %327 = vst [vmem:[%s939_s1 + $0x2f0] sm:$0xff] %v608_v3 }
  0x3e   :  { %328 = vst [vmem:[%s939_s1 + $0x330] sm:$0xff] %v608_v3 }
  0x3f   :  { %329 = vst [vmem:[%s939_s1 + $0x370] sm:$0xff] %v608_v3 }
  0x40   :  { %330 = vst [vmem:[%s939_s1 + $0x3b0] sm:$0xff] %v608_v3 }
  0x41   :  { %331 = vst [vmem:[%s939_s1 + $0x3f0] sm:$0xff] %v608_v3 }
  0x42   :  { %332 = vst [vmem:[%s939_s1 + $0x8] sm:$0xff] %v409_v0 }
  0x43   :  { %333 = vst [vmem:[%s939_s1 + $0x48] sm:$0xff] %v409_v0 }
  0x44   :  { %334 = vst [vmem:[%s939_s1 + $0x88] sm:$0xff] %v409_v0 }
  0x45   :  { %335 = vst [vmem:[%s939_s1 + $0xc8] sm:$0xff] %v409_v0 }
  0x46   :  { %336 = vst [vmem:[%s939_s1 + $0x108] sm:$0xff] %v409_v0 }
  0x47   :  { %337 = vst [vmem:[%s939_s1 + $0x148] sm:$0xff] %v409_v0 }
  0x48   :  { %338 = vst [vmem:[%s939_s1 + $0x188] sm:$0xff] %v409_v0 }
  0x49   :  { %339 = vst [vmem:[%s939_s1 + $0x1c8] sm:$0xff] %v409_v0 }
  0x4a   :  { %340 = vst [vmem:[%s939_s1 + $0x208] sm:$0xff] %v409_v0 }
  0x4b   :  { %341 = vst [vmem:[%s939_s1 + $0x248] sm:$0xff] %v409_v0 }
  0x4c   :  { %342 = vst [vmem:[%s939_s1 + $0x288] sm:$0xff] %v409_v0 }
  0x4d   :  { %343 = vst [vmem:[%s939_s1 + $0x2c8] sm:$0xff] %v409_v0 }
  0x4e   :  { %344 = vst [vmem:[%s939_s1 + $0x308] sm:$0xff] %v409_v0 }
  0x4f   :  { %345 = vst [vmem:[%s939_s1 + $0x348] sm:$0xff] %v409_v0 }
  0x50   :  { %346 = vst [vmem:[%s939_s1 + $0x388] sm:$0xff] %v409_v0 }
  0x51   :  { %347 = vst [vmem:[%s939_s1 + $0x3c8] sm:$0xff] %v409_v0 }
  0x52   :  { %348 = vst [vmem:[%s939_s1 + $0x18] sm:$0xff] %v470_v1 }
  0x53   :  { %349 = vst [vmem:[%s939_s1 + $0x58] sm:$0xff] %v470_v1 }
  0x54   :  { %350 = vst [vmem:[%s939_s1 + $0x98] sm:$0xff] %v470_v1 }
  0x55   :  { %351 = vst [vmem:[%s939_s1 + $0xd8] sm:$0xff] %v470_v1 }
  0x56   :  { %352 = vst [vmem:[%s939_s1 + $0x118] sm:$0xff] %v470_v1 }
  0x57   :  { %353 = vst [vmem:[%s939_s1 + $0x158] sm:$0xff] %v470_v1 }
  0x58   :  { %354 = vst [vmem:[%s939_s1 + $0x198] sm:$0xff] %v470_v1 }
  0x59   :  { %355 = vst [vmem:[%s939_s1 + $0x1d8] sm:$0xff] %v470_v1 }
  0x5a   :  { %356 = vst [vmem:[%s939_s1 + $0x218] sm:$0xff] %v470_v1 }
  0x5b   :  { %357 = vst [vmem:[%s939_s1 + $0x258] sm:$0xff] %v470_v1 }
  0x5c   :  { %358 = vst [vmem:[%s939_s1 + $0x298] sm:$0xff] %v470_v1 }
  0x5d   :  { %359 = vst [vmem:[%s939_s1 + $0x2d8] sm:$0xff] %v470_v1 }
  0x5e   :  { %360 = vst [vmem:[%s939_s1 + $0x318] sm:$0xff] %v470_v1 }
  0x5f   :  { %361 = vst [vmem:[%s939_s1 + $0x358] sm:$0xff] %v470_v1 }
  0x60   :  { %362 = vst [vmem:[%s939_s1 + $0x398] sm:$0xff] %v470_v1 }
  0x61   :  { %363 = vst [vmem:[%s939_s1 + $0x3d8] sm:$0xff] %v470_v1 }
  0x62   :  { %364 = vst [vmem:[%s939_s1 + $0x28] sm:$0xff] %v539_v2 }
  0x63   :  { %365 = vst [vmem:[%s939_s1 + $0x68] sm:$0xff] %v539_v2 }
  0x64   :  { %366 = vst [vmem:[%s939_s1 + $0xa8] sm:$0xff] %v539_v2 }
  0x65   :  { %367 = vst [vmem:[%s939_s1 + $0xe8] sm:$0xff] %v539_v2 }
  0x66   :  { %368 = vst [vmem:[%s939_s1 + $0x128] sm:$0xff] %v539_v2 }
  0x67   :  { %369 = vst [vmem:[%s939_s1 + $0x168] sm:$0xff] %v539_v2 }
  0x68   :  { %370 = vst [vmem:[%s939_s1 + $0x1a8] sm:$0xff] %v539_v2 }
  0x69   :  { %371 = vst [vmem:[%s939_s1 + $0x1e8] sm:$0xff] %v539_v2 }
  0x6a   :  { %372 = vst [vmem:[%s939_s1 + $0x228] sm:$0xff] %v539_v2 }
  0x6b   :  { %373 = vst [vmem:[%s939_s1 + $0x268] sm:$0xff] %v539_v2 }
  0x6c   :  { %374 = vst [vmem:[%s939_s1 + $0x2a8] sm:$0xff] %v539_v2 }
  0x6d   :  { %375 = vst [vmem:[%s939_s1 + $0x2e8] sm:$0xff] %v539_v2 }
  0x6e   :  { %376 = vst [vmem:[%s939_s1 + $0x328] sm:$0xff] %v539_v2 }
  0x6f   :  { %377 = vst [vmem:[%s939_s1 + $0x368] sm:$0xff] %v539_v2 }
  0x70   :  { %378 = vst [vmem:[%s939_s1 + $0x3a8] sm:$0xff] %v539_v2 }
  0x71   :  { %379 = vst [vmem:[%s939_s1 + $0x3e8] sm:$0xff] %v539_v2 }
  0x72   :  { %380 = vst [vmem:[%s939_s1 + $0x38] sm:$0xff] %v608_v3 }
  0x73   :  { %381 = vst [vmem:[%s939_s1 + $0x78] sm:$0xff] %v608_v3 }
  0x74   :  { %382 = vst [vmem:[%s939_s1 + $0xb8] sm:$0xff] %v608_v3 }
  0x75   :  { %383 = vst [vmem:[%s939_s1 + $0xf8] sm:$0xff] %v608_v3 }
  0x76   :  { %384 = vst [vmem:[%s939_s1 + $0x138] sm:$0xff] %v608_v3 }
  0x77   :  { %385 = vst [vmem:[%s939_s1 + $0x178] sm:$0xff] %v608_v3 }
  0x78   :  { %386 = vst [vmem:[%s939_s1 + $0x1b8] sm:$0xff] %v608_v3 }
  0x79   :  { %387 = vst [vmem:[%s939_s1 + $0x1f8] sm:$0xff] %v608_v3 }
  0x7a   :  { %388 = vst [vmem:[%s939_s1 + $0x238] sm:$0xff] %v608_v3 }
  0x7b   :  { %389 = vst [vmem:[%s939_s1 + $0x278] sm:$0xff] %v608_v3 }
  0x7c   :  { %390 = vst [vmem:[%s939_s1 + $0x2b8] sm:$0xff] %v608_v3 }
  0x7d   :  { %391 = vst [vmem:[%s939_s1 + $0x2f8] sm:$0xff] %v608_v3 }
  0x7e   :  { %392 = vst [vmem:[%s939_s1 + $0x338] sm:$0xff] %v608_v3 }
  0x7f   :  { %393 = vst [vmem:[%s939_s1 + $0x378] sm:$0xff] %v608_v3 }
  0x80   :  { %394 = vst [vmem:[%s939_s1 + $0x3b8] sm:$0xff] %v608_v3 }
  0x81   :  { %395 = vst [vmem:[%s939_s1 + $0x3f8] sm:$0xff] %v608_v3 }

// kernel: tile.28
= control target key start
LH: loop header
LB: loop body
LE: loop exit
PB: predicated region body
PF: predicated region fallthrough
CT: control target
= control target key end

     0   :  { %s28_s0 = inlined_call_operand.vmem [shape: f32[4], index: 0, kind: input, shape index: {}]   ;;  %s29_s1 = inlined_call_operand.vmem [shape: f32[16,4], index: 1, kind: output, shape index: {}]  }
   0x1   :  { %v4_v0 = vld [vmem:[%s28_s0] ss:$0 sm:$0xff] }
   0x2   :  { %5 = vst [vmem:[%s29_s1] sm:$0xff] %v4_v0 }
   0x3   :  { %8 = vst [vmem:[%s29_s1 + $0x8] sm:$0xff] %v4_v0 }

// kernel: tile.38
= control target key start
LH: loop header
LB: loop body
LE: loop exit
PB: predicated region body
PF: predicated region fallthrough
CT: control target
= control target key end

     0   :  { %s131_s10 = smov 60   ;;  %s132_s11 = smov 52   ;;  %vm3_vm0 = vcmask 31744   ;;  %vm9_vm1 = vcmask 523744   ;;  %vm15_vm2 = vcmask 490944   ;;  %vm21_vm3 = vcmask 458144   ;;  %s207_s0 = inlined_call_operand.vmem [shape: f32[16,4], index: 0, kind: input, shape index: {}]   ;;  %s208_s1 = inlined_call_operand.vmem [shape: f32[1,64], index: 1, kind: output, shape index: {}]  }
   0x1   :  { %v101_v0 = vld [vmem:[%s207_s0 + $0xf] sm:$0x1]   ;;  %v103_v1 = vld [vmem:[%s207_s0 + $0xd] sm:$0x1]   ;;  %v105_v2 = vld [vmem:[%s207_s0 + $0xb] sm:$0x1]  }
   0x2   :  { %7 = vrot.lane.b32.xlu0 %v101_v0, %s131_s10  ;;  %19 = vrot.lane.b32.xlu1 %v103_v1, %s132_s11  ;;  %s133_s14 = smov 44   ;;  %v102_v3 = vld [vmem:[%s207_s0 + $0xe] sm:$0x1]   ;;  %v104_v4 = vld [vmem:[%s207_s0 + $0xc] sm:$0x1]   ;;  %s134_s19 = smov 56  }
   0x3   :  { %31 = vrot.lane.b32.xlu2 %v105_v2, %s133_s14  ;;  %s135_s20 = smov 48   ;;  %v106_v5 = vld [vmem:[%s207_s0 + $0xa] sm:$0x1]   ;;  %s136_s23 = smov 40   ;;  %v107_v6 = vld [vmem:[%s207_s0 + $0x9] sm:$0x1]  }
   0x4   :  { %v108_v7 = vld [vmem:[%s207_s0 + $0x8] sm:$0x1]   ;;  %s137_s28 = smov 36   ;;  %s138_s29 = smov 32   ;;  %v109_v8 = vld [vmem:[%s207_s0 + $0x7] sm:$0x1]  }
   0x5   :  { %s139_s3 = smov 28   ;;  %v110_v9 = vld [vmem:[%s207_s0 + $0x6] sm:$0x1]   ;;  %v111_v10 = vld [vmem:[%s207_s0 + $0x5] sm:$0x1]   ;;  %s140_s8 = smov 24  }
   0x6   :  { %s141_s9 = smov 20   ;;  %v112_v11 = vld [vmem:[%s207_s0 + $0x4] sm:$0x1]   ;;  %s142_s12 = smov 16   ;;  %v113_v12 = vld [vmem:[%s207_s0 + $0x3] sm:$0x1]  }
   0x7   :  { %v114_v13 = vld [vmem:[%s207_s0 + $0x2] sm:$0x1]   ;;  %s143_s17 = smov 12   ;;  %s144_s18 = smov 8   ;;  %v115_v14 = vld [vmem:[%s207_s0 + $0x1] sm:$0x1]  }
   0x8   :  { %s145_s21 = smov 4   ;;  %v2_v15 = vld [vmem:[%s207_s0] sm:$0x1]   ;;  %vm27_vm4 = vcmask 425344   ;;  %vm33_vm5 = vcmask 392544   ;;  %vm39_vm6 = vcmask 359744  }
   0x9   :  { %4 = vst.msk [vmem:[#allocation0] sm:$0x1] %vm3_vm0, %v2_v15   ;;  %vm45_vm7 = vcmask 326944   ;;  %vm51_vm8 = vcmask 294144   ;;  %vm57_vm9 = vcmask 261344   ;;  %vm63_vm10 = vcmask 228544  }
   0xa   :  { %13 = vrot.lane.b32.xlu0 %v102_v3, %s134_s19  ;;  %25 = vrot.lane.b32.xlu1 %v104_v4, %s135_s20  ;;  %vm69_vm11 = vcmask 195744   ;;  %vm75_vm12 = vcmask 162944   ;;  %vm81_vm13 = vcmask 130144   ;;  %vm87_vm14 = vcmask 97344  }
   0xb   :  { %37 = vrot.lane.b32.xlu2 %v106_v5, %s136_s23  ;;  %vm93_vm15 = vcmask 64544  }
  0x12   :  { %43 = vrot.lane.b32.xlu0 %v107_v6, %s137_s28  ;;  %49 = vrot.lane.b32.xlu1 %v108_v7, %s138_s29 }
  0x13   :  { %55 = vrot.lane.b32.xlu2 %v109_v8, %s139_s3 }
  0x1a   :  { %61 = vrot.lane.b32.xlu0 %v110_v9, %s140_s8  ;;  %67 = vrot.lane.b32.xlu1 %v111_v10, %s141_s9 }
  0x1b   :  { %73 = vrot.lane.b32.xlu2 %v112_v11, %s142_s12 }
  0x22   :  { %79 = vrot.lane.b32.xlu0 %v113_v12, %s143_s17  ;;  %85 = vrot.lane.b32.xlu1 %v114_v13, %s144_s18 }
  0x23   :  { %91 = vrot.lane.b32.xlu2 %v115_v14, %s145_s21 }
  0x5d   :  { %v32_v16 = vpop.permute.xlu2 %31  }
  0x65   :  { %v38_v17 = vpop.permute.xlu2 %37  }
  0x6d   :  { %v56_v18 = vpop.permute.xlu2 %55  }
  0x74   :  { %v8_v19 = vpop.permute.xlu0 %7   ;;  %v20_v20 = vpop.permute.xlu1 %19  }
  0x75   :  { %10 = vst.msk [vmem:[#allocation0] sm:$0x1] %vm9_vm1, %v8_v19   ;;  %v74_v21 = vpop.permute.xlu2 %73  }
  0x7c   :  { %v14_v22 = vpop.permute.xlu0 %13   ;;  %v26_v23 = vpop.permute.xlu1 %25  }
  0x7d   :  { %16 = vst.msk [vmem:[#allocation0] sm:$0x1] %vm15_vm2, %v14_v22   ;;  %v92_v24 = vpop.permute.xlu2 %91  }
  0x7e   :  { %22 = vst.msk [vmem:[#allocation0] sm:$0x1] %vm21_vm3, %v20_v20  }
  0x7f   :  { %28 = vst.msk [vmem:[#allocation0] sm:$0x1] %vm27_vm4, %v26_v23  }
  0x80   :  { %34 = vst.msk [vmem:[#allocation0] sm:$0x1] %vm33_vm5, %v32_v16  }
  0x81   :  { %40 = vst.msk [vmem:[#allocation0] sm:$0x1] %vm39_vm6, %v38_v17  }
  0x84   :  { %v44_v25 = vpop.permute.xlu0 %43   ;;  %v50_v26 = vpop.permute.xlu1 %49  }
  0x85   :  { %46 = vst.msk [vmem:[#allocation0] sm:$0x1] %vm45_vm7, %v44_v25  }
  0x86   :  { %52 = vst.msk [vmem:[#allocation0] sm:$0x1] %vm51_vm8, %v50_v26  }
  0x87   :  { %58 = vst.msk [vmem:[#allocation0] sm:$0x1] %vm57_vm9, %v56_v18  }
  0x8c   :  { %v62_v27 = vpop.permute.xlu0 %61   ;;  %v68_v28 = vpop.permute.xlu1 %67  }
  0x8d   :  { %64 = vst.msk [vmem:[#allocation0] sm:$0x1] %vm63_vm10, %v62_v27  }
  0x8e   :  { %70 = vst.msk [vmem:[#allocation0] sm:$0x1] %vm69_vm11, %v68_v28  }
  0x8f   :  { %76 = vst.msk [vmem:[#allocation0] sm:$0x1] %vm75_vm12, %v74_v21  }
  0x94   :  { %v80_v29 = vpop.permute.xlu0 %79   ;;  %v86_v30 = vpop.permute.xlu1 %85  }
  0x95   :  { %82 = vst.msk [vmem:[#allocation0] sm:$0x1] %vm81_vm13, %v80_v29  }
  0x96   :  { %88 = vst.msk [vmem:[#allocation0] sm:$0x1] %vm87_vm14, %v86_v30  }
  0x97   :  { %94 = vst.msk [vmem:[#allocation0] sm:$0x1] %vm93_vm15, %v92_v24  }
  0x9e   :  { %v97_v31 = vld [vmem:[#allocation0] sm:$0x1] }
  0x9f   :  { %100 = vst [vmem:[%s208_s1] sm:$0x1] %v97_v31 }

// kernel: resblock_forward.1
= control target key start
LH: loop header
LB: loop body
LE: loop exit
PB: predicated region body
PF: predicated region fallthrough
CT: control target
= control target key end

     0   :  { %s646_s22 = smov 64   ;;  %vm96_vm0 = vcmask 523264   ;;  %vm73_vm1 = vcmask 1046528   ;;  %vm60_vm2 = vcmask 1040384   ;;  %s1057_s0 = inlined_call_operand.vmem [shape: f32[32,64], index: 0, kind: input, shape index: {}]   ;;  %s1058_s1 = inlined_call_operand.vmem [shape: f32[192,64], index: 1, kind: input, shape index: {}]   ;;  %s1059_s3 = inlined_call_operand.vmem [shape: f32[64,64], index: 3, kind: input, shape index: {}]   ;;  %s1060_s4 = inlined_call_operand.vmem [shape: f32[4,64], index: 4, kind: input, shape index: {}]   ;;  %s1061_s2 = inlined_call_operand.vmem [shape: f32[192,64], index: 2, kind: input, shape index: {}]   ;;  %s1062_s5 = inlined_call_operand.vmem [shape: f32[32,64], index: 5, kind: output, shape index: {}]  }
   0x1   :  { %v680_v0 = vld [vmem:[%s1057_s0] sm:$0xff]  ;;  %v685_v1 = vld [vmem:[%s1057_s0 + $0x10] sm:$0xff]  ;;  %v47_v2 = vld [vmem:[%s1058_s1 + $0x78] sm:$0xff] }
   0x2   :  { %84 = vrot.lane.b32.xlu0 %v680_v0, %s646_s22  ;;  %88 = vrot.lane.b32.xlu1 %v685_v1, %s646_s22  ;;  %v46_v3 = vld [vmem:[%s1058_s1 + $0x70] sm:$0xff]  ;;  %v45_v4 = vld [vmem:[%s1058_s1 + $0x68] sm:$0xff]  ;;  %v74_v26 = vrot.slane %v680_v0, 1  ;;  %v77_v32 = vrot.slane %v685_v1, 1  ;;  %v61_v36 = vrot.slane %v680_v0, 7  ;;  %v64_v49 = vrot.slane %v685_v1, 7 }
   0x3   :  { %111 = vmatpush.msra.mxu0 %v47_v2  ;;  %v55_v5 = vld [vmem:[%s1058_s1 + $0xb8] sm:$0xff]  ;;  %v44_v6 = vld [vmem:[%s1058_s1 + $0x60] sm:$0xff]  ;;  %v54_v7 = vld [vmem:[%s1058_s1 + $0xb0] sm:$0xff] }
   0x4   :  { %148 = vmatpush.msra.mxu1 %v55_v5  ;;  %v712_v8 = vld [vmem:[%s1057_s0 + $0x8] sm:$0xff]  ;;  %v717_v9 = vld [vmem:[%s1057_s0 + $0x18] sm:$0xff]  ;;  %v42_v12 = vld [vmem:[%s1058_s1 + $0x50] sm:$0xff]  ;;  %v71_v40 = vsel %vm60_vm2, 0.0, %v61_v36  ;;  %v72_v52 = vsel %vm60_vm2, 0.0, %v64_v49 }
   0x5   :  { %112 = vmatpush.msra.mxu0 %v46_v3  ;;  %v43_v10 = vld [vmem:[%s1058_s1 + $0x58] sm:$0xff]  ;;  %v53_v11 = vld [vmem:[%s1058_s1 + $0xa8] sm:$0xff]  ;;  %v52_v13 = vld [vmem:[%s1058_s1 + $0xa0] sm:$0xff]  ;;  %v75_v27 = vrot.slane %v712_v8, 1  ;;  %v78_v33 = vrot.slane %v717_v9, 1  ;;  %v62_v45 = vrot.slane %v712_v8, 7 }
   0x6   :  { %149 = vmatpush.msra.mxu1 %v54_v7  ;;  %v41_v14 = vld [vmem:[%s1058_s1 + $0x48] sm:$0xff]  ;;  %v51_v15 = vld [vmem:[%s1058_s1 + $0x98] sm:$0xff]  ;;  %v40_v16 = vld [vmem:[%s1058_s1 + $0x40] sm:$0xff]  ;;  %v65_v54 = vrot.slane %v717_v9, 7 }
   0x7   :  { %113 = vmatpush.msra.mxu0 %v45_v4  ;;  %v50_v17 = vld [vmem:[%s1058_s1 + $0x90] sm:$0xff]  ;;  %v39_v18 = vld [vmem:[%s1058_s1 + $0x38] sm:$0xff]  ;;  %v49_v19 = vld [vmem:[%s1058_s1 + $0x88] sm:$0xff]  ;;  %v76_v30 = vsel %vm73_vm1, %v74_v26, %v75_v27  ;;  %v82_v31 = vsel %vm73_vm1, %v75_v27, 0.0  ;;  %v79_v34 = vsel %vm73_vm1, %v77_v32, %v78_v33  ;;  %v83_v35 = vsel %vm73_vm1, %v78_v33, 0.0 }
   0x8   :  { %150 = vmatpush.msra.mxu1 %v53_v11  ;;  %v38_v20 = vld [vmem:[%s1058_s1 + $0x30] sm:$0xff]  ;;  %v37_v21 = vld [vmem:[%s1058_s1 + $0x28] sm:$0xff]  ;;  %v36_v22 = vld [vmem:[%s1058_s1 + $0x20] sm:$0xff]  ;;  %v63_v47 = vsel %vm60_vm2, %v61_v36, %v62_v45  ;;  %v66_v56 = vsel %vm60_vm2, %v64_v49, %v65_v54 }
   0x9   :  { %114 = vmatpush.msra.mxu0 %v44_v6  ;;  %v35_v23 = vld [vmem:[%s1058_s1 + $0x18] sm:$0xff]  ;;  %v34_v24 = vld [vmem:[%s1058_s1 + $0x10] sm:$0xff]  ;;  %v33_v25 = vld [vmem:[%s1058_s1 + $0x8] sm:$0xff] }
   0xa   :  { %86 = vrot.lane.b32.xlu0 %v712_v8, %s646_s22  ;;  %90 = vrot.lane.b32.xlu1 %v717_v9, %s646_s22  ;;  %v32_v28 = vld [vmem:[%s1058_s1] sm:$0xff]  ;;  %v793_v37 = vld [vmem:[%s1059_s3 + $0x38] sm:$0xff] }
   0xb   :  { %115 = vmatpush.msra.mxu0 %v43_v10  ;;  %151 = vmatpush.msra.mxu1 %v52_v13  ;;  %v48_v29 = vld [vmem:[%s1058_s1 + $0x80] sm:$0xff]  ;;  %v798_v38 = vld [vmem:[%s1059_s3 + $0x30] sm:$0xff]  ;;  %v805_v39 = vld [vmem:[%s1059_s3 + $0x28] sm:$0xff] }
   0xc   :  { %191 = vmatpush.msra.mxu2 %v793_v37  ;;  %254 = vmatpush.msra.mxu3 %v793_v37  ;;  %v814_v41 = vld [vmem:[%s1059_s3 + $0x20] sm:$0xff]  ;;  %v822_v43 = vld [vmem:[%s1059_s3 + $0x18] sm:$0xff]  ;;  %v832_v46 = vld [vmem:[%s1059_s3 + $0x10] sm:$0xff] }
   0xd   :  { %116 = vmatpush.msra.mxu0 %v42_v12  ;;  %152 = vmatpush.msra.mxu1 %v51_v15  ;;  %v852_v58 = vld [vmem:[%s1059_s3 + $0x8] sm:$0xff]  ;;  %v859_v59 = vld [vmem:[%s1059_s3] sm:$0xff] }
   0xe   :  { %192 = vmatpush.msra.mxu2 %v798_v38  ;;  %255 = vmatpush.msra.mxu3 %v798_v38 }
   0xf   :  { %117 = vmatpush.msra.mxu0 %v41_v14  ;;  %153 = vmatpush.msra.mxu1 %v50_v17 }
  0x10   :  { %193 = vmatpush.msra.mxu2 %v805_v39  ;;  %256 = vmatpush.msra.mxu3 %v805_v39 }
  0x11   :  { %118 = vmatpush.msra.mxu0 %v40_v16  ;;  %154 = vmatpush.msra.mxu1 %v49_v19 }
  0x12   :  { %194 = vmatpush.msra.mxu2 %v814_v41  ;;  %257 = vmatpush.msra.mxu3 %v814_v41 }
  0x13   :  { %119 = vmatpush.msra.mxu0 %v39_v18  ;;  %155 = vmatpush.msra.mxu1 %v48_v29 }
  0x14   :  { %607 = vmatmul.msk.f32.vlgmr.msra.gmra.mxu1 %vm96_vm0, %v76_v30  ;;  %195 = vmatpush.msra.mxu2 %v822_v43 }
  0x15   :  { %120 = vmatpush.msra.mxu0 %v38_v20  ;;  %258 = vmatpush.msra.mxu3 %v822_v43 }
  0x16   :  { %196 = vmatpush.msra.mxu2 %v832_v46 }
  0x17   :  { %121 = vmatpush.msra.mxu0 %v37_v21  ;;  %259 = vmatpush.msra.mxu3 %v832_v46 }
  0x18   :  { %197 = vmatpush.msra.mxu2 %v852_v58 }
  0x19   :  { %122 = vmatpush.msra.mxu0 %v36_v22  ;;  %260 = vmatpush.msra.mxu3 %v852_v58 }
  0x1a   :  { %198 = vmatpush.msra.mxu2 %v859_v59 }
  0x1b   :  { %123 = vmatpush.msra.mxu0 %v35_v23  ;;  %261 = vmatpush.msra.mxu3 %v859_v59 }
  0x1c   :  { %608 = vmatmul.msk.f32.gmra.mxu1 %vm96_vm0, %v82_v31 }
  0x1d   :  { %124 = vmatpush.msra.mxu0 %v34_v24  ;;  %471 = vmatpush.msrb.mxu3 %v793_v37 }
  0x1f   :  { %125 = vmatpush.msra.mxu0 %v33_v25  ;;  %472 = vmatpush.msrb.mxu3 %v798_v38 }
  0x21   :  { %126 = vmatpush.msra.mxu0 %v32_v28  ;;  %473 = vmatpush.msrb.mxu3 %v805_v39 }
  0x23   :  { %534 = vmatpush.msrb.mxu0 %v793_v37  ;;  %474 = vmatpush.msrb.mxu3 %v814_v41 }
  0x24   :  { %609 = vmatmul.msk.f32.gmra.mxu1 %vm96_vm0, %v79_v34 }
  0x25   :  { %535 = vmatpush.msrb.mxu0 %v798_v38  ;;  %475 = vmatpush.msrb.mxu3 %v822_v43 }
  0x27   :  { %536 = vmatpush.msrb.mxu0 %v805_v39  ;;  %476 = vmatpush.msrb.mxu3 %v832_v46 }
  0x29   :  { %537 = vmatpush.msrb.mxu0 %v814_v41  ;;  %477 = vmatpush.msrb.mxu3 %v852_v58 }
  0x2b   :  { %538 = vmatpush.msrb.mxu0 %v822_v43  ;;  %478 = vmatpush.msrb.mxu3 %v859_v59 }
  0x2c   :  { %610 = vmatmul.msk.f32.gmra.mxu1 %vm96_vm0, %v83_v35 }
  0x2d   :  { %539 = vmatpush.msrb.mxu0 %v832_v46 }
  0x2f   :  { %540 = vmatpush.msrb.mxu0 %v852_v58 }
  0x31   :  { %541 = vmatpush.msrb.mxu0 %v859_v59 }
  0x74   :  { %v85_v42 = vpop.permute.xlu0 %84  ;;  %v89_v51 = vpop.permute.xlu1 %88 }
  0x75   :  { %v97_v44 = vsel %vm96_vm0, %v71_v40, %v85_v42  ;;  %v99_v53 = vsel %vm96_vm0, %v72_v52, %v89_v51 }
  0x76   :  { %127 = vmatmul.f32.vlgmr.msra.gmra.mxu0 %v97_v44 }
  0x7c   :  { %v87_v48 = vpop.permute.xlu0 %86  ;;  %v91_v55 = vpop.permute.xlu1 %90 }
  0x7d   :  { %v98_v50 = vsel %vm96_vm0, %v63_v47, %v87_v48  ;;  %v100_v57 = vsel %vm96_vm0, %v66_v56, %v91_v55  ;;  %v338_v55 = vld [vmem:[%s1061_s2 + $0xb8] sm:$0xff]  ;;  %v337_v56 = vld [vmem:[%s1061_s2 + $0xb0] sm:$0xff] }
  0x7e   :  { %130 = vmatmul.f32.gmra.mxu0 %v98_v50  ;;  %428 = vmatpush.msrb.mxu2 %v338_v55 }
  0x80   :  { %429 = vmatpush.msrb.mxu2 %v337_v56  ;;  %v325_v56 = vld [vmem:[%s1061_s2 + $0x50] sm:$0xff] }
  0x86   :  { %133 = vmatmul.f32.gmra.mxu0 %v99_v53 }
  0x8e   :  { %136 = vmatmul.f32.gmra.mxu0 %v100_v57 }
  0x91   :  { %v157_v60 = vpop.f32.mrf.mxu1 }
  0x99   :  { %v160_v63 = vpop.f32.mrf.mxu1 }
  0xa1   :  { %v163_v4 = vpop.f32.mrf.mxu1 }
  0xa9   :  { %v166_v7 = vpop.f32.mrf.mxu1 }
  0xf3   :  { %v128_v61 = vpop.f32.mrf.mxu0 }
  0xf4   :  { %v158_v62 = vadd.f32 %v157_v60, %v128_v61  ;;  %v336_v60 = vld [vmem:[%s1061_s2 + $0xa8] sm:$0xff] }
  0xf5   :  { %430 = vmatpush.msrb.mxu2 %v336_v60  ;;  %v323_v60 = vld [vmem:[%s1061_s2 + $0x40] sm:$0xff] }
  0xf6   :  { %611 = vmatmul.msk.f32.vlgmr.msra.gmra.mxu2 %vm96_vm0, %v158_v62 }
  0xfb   :  { %v131_v2 = vpop.f32.mrf.mxu0 }
  0xfc   :  { %v161_v3 = vadd.f32 %v160_v63, %v131_v2  ;;  %v334_v2 = vld [vmem:[%s1061_s2 + $0x98] sm:$0xff] }
  0xfe   :  { %612 = vmatmul.msk.f32.gmra.mxu2 %vm96_vm0, %v161_v3 }
 0x103   :  { %v134_v5 = vpop.f32.mrf.mxu0 }
 0x104   :  { %v164_v6 = vadd.f32 %v163_v4, %v134_v5  ;;  %v333_v4 = vld [vmem:[%s1061_s2 + $0x90] sm:$0xff] }
 0x106   :  { %613 = vmatmul.msk.f32.gmra.mxu2 %vm96_vm0, %v164_v6 }
 0x10b   :  { %v137_v10 = vpop.f32.mrf.mxu0 }
 0x10c   :  { %v167_v11 = vadd.f32 %v166_v7, %v137_v10 }
 0x10e   :  { %614 = vmatmul.msk.f32.gmra.mxu2 %vm96_vm0, %v167_v11 }
 0x179   :  { %v200_v12 = vpop.f32.mrf.mxu2 }
 0x17a   :  { %v212_v16 = vsel %vm96_vm0, %v200_v12, 0.0 }
 0x181   :  { %v203_v13 = vpop.f32.mrf.mxu2 }
 0x182   :  { %v213_v15 = vsel %vm96_vm0, %v203_v13, 0.0 }
 0x183   :  { %v214_v18 = vadd.f32 %v213_v15, %v212_v16 }
 0x189   :  { %v206_v14 = vpop.f32.mrf.mxu2 }
 0x18a   :  { %v215_v17 = vsel %vm96_vm0, %v206_v14, 0.0 }
 0x18b   :  { %v216_v19 = vadd.f32 %v215_v17, %v214_v18 }
 0x191   :  { %v209_v20 = vpop.f32.mrf.mxu2 }
 0x192   :  { %v217_v21 = vsel %vm96_vm0, %v209_v20, 0.0 }
 0x193   :  { %v218_v22 = vadd.f32 %v217_v21, %v216_v19  ;;  %v169_v19 = vld [vmem:[%s1060_s4] sm:$0x1] }
 0x195   :  { %v219_v23 = vrot.slane %v218_v22, 4 }
 0x197   :  { %v220_v24 = vadd.f32 %v219_v23, %v218_v22  ;;  %v640_v23 = vld [vmem:[%s1060_s4 + $0x1] ss:$0 sm:$0xff] }
 0x199   :  { %v221_v25 = vrot.slane %v220_v24, 2 }
 0x19b   :  { %v222_v26 = vadd.f32 %v221_v25, %v220_v24 }
 0x19d   :  { %v223_v27 = vrot.slane %v222_v26, 1 }
 0x19f   :  { %v224_v28 = vadd.f32 %v223_v27, %v222_v26 }
 0x1a1   :  { %v225_v29 = vmul.f32 0.001953125, %v224_v28  ;;  %v330_v28 = vld [vmem:[%s1061_s2 + $0x78] sm:$0xff] }
 0x1a2   :  { %391 = vmatpush.msrb.mxu1 %v330_v28 }
 0x1a3   :  { %v881_v30 = vsub.f32 %v158_v62, %v225_v29  ;;  %v886_v32 = vsub.f32 %v161_v3, %v225_v29  ;;  %v228_v34 = vsub.f32 %v164_v6, %v225_v29  ;;  %v229_v36 = vsub.f32 %v167_v11, %v225_v29  ;;  %v335_v62 = vld [vmem:[%s1061_s2 + $0xa0] sm:$0xff]  ;;  %v332_v6 = vld [vmem:[%s1061_s2 + $0x88] sm:$0xff]  ;;  %v329_v29 = vld [vmem:[%s1061_s2 + $0x70] sm:$0xff] }
 0x1a4   :  { %431 = vmatpush.msrb.mxu2 %v335_v62  ;;  %v331_v11 = vld [vmem:[%s1061_s2 + $0x80] sm:$0xff]  ;;  %392 = vmatpush.msrb.mxu1 %v329_v29  ;;  %v322_v62 = vld [vmem:[%s1061_s2 + $0x38] sm:$0xff] }
 0x1a5   :  { %v230_v31 = vmul.f32 %v881_v30, %v881_v30  ;;  %v231_v33 = vmul.f32 %v886_v32, %v886_v32  ;;  %v232_v35 = vmul.f32 %v228_v34, %v228_v34  ;;  %v233_v40 = vmul.f32 %v229_v36, %v229_v36 }
 0x1a6   :  { %432 = vmatpush.msrb.mxu2 %v334_v2 }
 0x1a7   :  { %615 = vmatmul.msk.f32.vlgmr.msra.gmra.mxu3 %vm96_vm0, %v230_v31 }
 0x1a8   :  { %433 = vmatpush.msrb.mxu2 %v333_v4  ;;  %v320_v4 = vld [vmem:[%s1061_s2 + $0x28] sm:$0xff] }
 0x1aa   :  { %434 = vmatpush.msrb.mxu2 %v332_v6 }
 0x1ac   :  { %435 = vmatpush.msrb.mxu2 %v331_v11  ;;  %v316_v11 = vld [vmem:[%s1061_s2 + $0x8] sm:$0xff] }
 0x1af   :  { %616 = vmatmul.msk.f32.gmra.mxu3 %vm96_vm0, %v231_v33 }
 0x1b7   :  { %617 = vmatmul.msk.f32.gmra.mxu3 %vm96_vm0, %v232_v35 }
 0x1bf   :  { %618 = vmatmul.msk.f32.gmra.mxu3 %vm96_vm0, %v233_v40 }
 0x22a   :  { %v263_v42 = vpop.f32.mrf.mxu3 }
 0x22b   :  { %v275_v48 = vsel %vm96_vm0, %v263_v42, 0.0 }
 0x232   :  { %v266_v44 = vpop.f32.mrf.mxu3 }
 0x233   :  { %v276_v47 = vsel %vm96_vm0, %v266_v44, 0.0 }
 0x234   :  { %v277_v50 = vadd.f32 %v276_v47, %v275_v48  ;;  %v327_v47 = vld [vmem:[%s1061_s2 + $0x60] sm:$0xff] }
 0x23a   :  { %v269_v45 = vpop.f32.mrf.mxu3 }
 0x23b   :  { %v278_v49 = vsel %vm96_vm0, %v269_v45, 0.0 }
 0x23c   :  { %v279_v51 = vadd.f32 %v278_v49, %v277_v50 }
 0x242   :  { %v272_v52 = vpop.f32.mrf.mxu3 }
 0x243   :  { %v280_v53 = vsel %vm96_vm0, %v272_v52, 0.0 }
 0x244   :  { %v281_v54 = vadd.f32 %v280_v53, %v279_v51  ;;  %v326_v53 = vld [vmem:[%s1061_s2 + $0x58] sm:$0xff] }
 0x246   :  { %v282_v57 = vrot.slane %v281_v54, 4 }
 0x248   :  { %v283_v61 = vadd.f32 %v282_v57, %v281_v54  ;;  %v324_v57 = vld [vmem:[%s1061_s2 + $0x48] sm:$0xff] }
 0x24a   :  { %v284_v63 = vrot.slane %v283_v61, 2 }
 0x24c   :  { %v285_v3 = vadd.f32 %v284_v63, %v283_v61  ;;  %v321_v63 = vld [vmem:[%s1061_s2 + $0x30] sm:$0xff] }
 0x24e   :  { %v286_v5 = vrot.slane %v285_v3, 1 }
 0x250   :  { %v287_v7 = vadd.f32 %v286_v5, %v285_v3  ;;  %v319_v5 = vld [vmem:[%s1061_s2 + $0x20] sm:$0xff] }
 0x252   :  { %v288_v10 = vmul.f32 0.001953125, %v287_v7  ;;  %v318_v7 = vld [vmem:[%s1061_s2 + $0x18] sm:$0xff] }
 0x254   :  { %v289_v12 = vadd.f32 1e-05, %v288_v10  ;;  %v317_v10 = vld [vmem:[%s1061_s2 + $0x10] sm:$0xff] }
 0x256   :  { %642 = vrsqrt.f32 %v289_v12  ;;  %vm296_vm4 = vweird.f32 %v289_v12 }
 0x25c   :  { %v643_v13 = vpop.eup %642 }
 0x25d   :  { %v291_v14 = vmul.f32 %v643_v13, %v289_v12  ;;  %vm297_vm3 = vweird.f32 %v643_v13 }
 0x25e   :  { %vm298_vm5 = vmor %vm296_vm4, %vm297_vm3 }
 0x25f   :  { %v292_v15 = vmul.f32 %v643_v13, %v291_v14 }
 0x261   :  { %v293_v16 = vmul.f32 0.5, %v292_v15 }
 0x263   :  { %v294_v17 = vsub.f32 1.5, %v293_v16 }
 0x265   :  { %v295_v18 = vmul.f32 %v643_v13, %v294_v17 }
 0x267   :  { %v299_v20 = vsel %vm298_vm5, %v643_v13, %v295_v18  ;;  %v315_v13 = vld [vmem:[%s1061_s2] sm:$0xff] }
 0x268   :  { %v300_v21 = vmul.f32 %v299_v20, %v169_v19 }
 0x26a   :  { %v301_v22 = vperm.slane %v300_v21, 0 }
 0x26c   :  { %v305_v24 = vmul.f32 %v301_v22, %v229_v36  ;;  %v304_v25 = vmul.f32 %v301_v22, %v228_v34  ;;  %v302_v26 = vmul.f32 %v301_v22, %v881_v30  ;;  %v303_v27 = vmul.f32 %v301_v22, %v886_v32  ;;  %v328_v32 = vld [vmem:[%s1061_s2 + $0x68] sm:$0xff] }
 0x26d   :  { %393 = vmatpush.msrb.mxu1 %v328_v32 }
 0x26e   :  { %v310_v31 = vadd.f32 %v640_v23, %v305_v24  ;;  %v309_v33 = vadd.f32 %v640_v23, %v304_v25  ;;  %v307_v35 = vadd.f32 %v640_v23, %v302_v26  ;;  %v308_v40 = vadd.f32 %v640_v23, %v303_v27 }
 0x26f   :  { %394 = vmatpush.msrb.mxu1 %v327_v47 }
 0x270   :  { %v314_v42 = vmax.f32 %v310_v31, 0.0  ;;  %v935_v36 = vmax.f32 %v309_v33, 0.0  ;;  %v937_v34 = vmax.f32 %v307_v35, 0.0  ;;  %v312_v30 = vmax.f32 %v308_v40, 0.0 }
 0x271   :  { %395 = vmatpush.msrb.mxu1 %v326_v53 }
 0x272   :  { %371 = vrot.lane.b32.xlu1 %v314_v42, %s646_s22  ;;  %369 = vrot.lane.b32.xlu0 %v935_v36, %s646_s22  ;;  %v355_v44 = vrot.slane %v937_v34, 1  ;;  %v356_v45 = vrot.slane %v312_v30, 1  ;;  %v343_v48 = vrot.slane %v937_v34, 7  ;;  %v344_v49 = vrot.slane %v312_v30, 7 }
 0x273   :  { %365 = vrot.lane.b32.xlu2 %v937_v34, %s646_s22  ;;  %v346_v50 = vrot.slane %v935_v36, 7  ;;  %v347_v51 = vrot.slane %v314_v42, 7  ;;  %396 = vmatpush.msrb.mxu1 %v325_v56  ;;  %v358_v2 = vrot.slane %v935_v36, 1  ;;  %v359_v3 = vrot.slane %v314_v42, 1 }
 0x274   :  { %v357_v52 = vsel %vm73_vm1, %v355_v44, %v356_v45  ;;  %v345_v54 = vsel %vm60_vm2, %v343_v48, %v344_v49  ;;  %v363_v61 = vsel %vm73_vm1, %v356_v45, 0.0  ;;  %v353_v15 = vsel %vm60_vm2, 0.0, %v343_v48 }
 0x275   :  { %619 = vmatmul.msk.f32.vlgmr.msrb.gmra.mxu2 %vm96_vm0, %v357_v52  ;;  %v348_v55 = vsel %vm60_vm2, %v346_v50, %v347_v51  ;;  %397 = vmatpush.msrb.mxu1 %v324_v57  ;;  %v360_v6 = vsel %vm73_vm1, %v358_v2, %v359_v3  ;;  %v364_v12 = vsel %vm73_vm1, %v359_v3, 0.0 }
 0x277   :  { %398 = vmatpush.msrb.mxu1 %v323_v60 }
 0x279   :  { %399 = vmatpush.msrb.mxu1 %v322_v62 }
 0x27b   :  { %367 = vrot.lane.b32.xlu2 %v312_v30, %s646_s22  ;;  %400 = vmatpush.msrb.mxu1 %v321_v63 }
 0x27d   :  { %620 = vmatmul.msk.f32.gmra.mxu2 %vm96_vm0, %v363_v61  ;;  %401 = vmatpush.msrb.mxu1 %v320_v4 }
 0x27f   :  { %402 = vmatpush.msrb.mxu1 %v319_v5 }
 0x281   :  { %403 = vmatpush.msrb.mxu1 %v318_v7 }
 0x283   :  { %404 = vmatpush.msrb.mxu1 %v317_v10 }
 0x285   :  { %621 = vmatmul.msk.f32.gmra.mxu2 %vm96_vm0, %v360_v6  ;;  %405 = vmatpush.msrb.mxu1 %v316_v11 }
 0x287   :  { %406 = vmatpush.msrb.mxu1 %v315_v13 }
 0x289   :  { %631 = vmatpush.msra.mxu1 %v793_v37 }
 0x28b   :  { %632 = vmatpush.msra.mxu1 %v798_v38 }
 0x28d   :  { %622 = vmatmul.msk.f32.gmra.mxu2 %vm96_vm0, %v364_v12  ;;  %633 = vmatpush.msra.mxu1 %v805_v39 }
 0x28f   :  { %634 = vmatpush.msra.mxu1 %v814_v41  ;;  %v354_v41 = vsel %vm60_vm2, 0.0, %v346_v50 }
 0x291   :  { %635 = vmatpush.msra.mxu1 %v822_v43 }
 0x293   :  { %636 = vmatpush.msra.mxu1 %v832_v46 }
 0x295   :  { %637 = vmatpush.msra.mxu1 %v852_v58 }
 0x297   :  { %638 = vmatpush.msra.mxu1 %v859_v59 }
 0x2cd   :  { %v366_v14 = vpop.permute.xlu2 %365 }
 0x2ce   :  { %v377_v16 = vsel %vm96_vm0, %v353_v15, %v366_v14 }
 0x2cf   :  { %407 = vmatmul.f32.vlgmr.msrb.gmra.mxu1 %v377_v16 }
 0x2d5   :  { %v368_v37 = vpop.permute.xlu2 %367 }
 0x2d6   :  { %v378_v38 = vsel %vm96_vm0, %v345_v54, %v368_v37 }
 0x2d7   :  { %410 = vmatmul.f32.gmra.mxu1 %v378_v38 }
 0x2e4   :  { %v370_v39 = vpop.permute.xlu0 %369  ;;  %v372_v46 = vpop.permute.xlu1 %371 }
 0x2e5   :  { %v379_v43 = vsel %vm96_vm0, %v354_v41, %v370_v39  ;;  %v380_v58 = vsel %vm96_vm0, %v348_v55, %v372_v46 }
 0x2e6   :  { %413 = vmatmul.f32.gmra.mxu1 %v379_v43 }
 0x2ee   :  { %416 = vmatmul.f32.gmra.mxu1 %v380_v58 }
 0x2f8   :  { %v437_v59 = vpop.f32.mrf.mxu2 }
 0x300   :  { %v440_v19 = vpop.f32.mrf.mxu2 }
 0x308   :  { %v443_v22 = vpop.f32.mrf.mxu2 }
 0x310   :  { %v446_v25 = vpop.f32.mrf.mxu2 }
 0x34c   :  { %v408_v17 = vpop.f32.mrf.mxu1 }
 0x34d   :  { %v438_v18 = vadd.f32 %v437_v59, %v408_v17 }
 0x34f   :  { %623 = vmatmul.msk.f32.vlgmr.msrb.gmra.mxu3 %vm96_vm0, %v438_v18 }
 0x354   :  { %v411_v20 = vpop.f32.mrf.mxu1 }
 0x355   :  { %v441_v21 = vadd.f32 %v440_v19, %v411_v20 }
 0x357   :  { %624 = vmatmul.msk.f32.gmra.mxu3 %vm96_vm0, %v441_v21 }
 0x363   :  { %v414_v23 = vpop.f32.mrf.mxu1 }
 0x364   :  { %v444_v24 = vadd.f32 %v443_v22, %v414_v23  ;;  %v641_v22 = vld [vmem:[%s1060_s4 + $0x3] ss:$0 sm:$0xff] }
 0x366   :  { %625 = vmatmul.msk.f32.gmra.mxu3 %vm96_vm0, %v444_v24 }
 0x36b   :  { %v417_v26 = vpop.f32.mrf.mxu1 }
 0x36c   :  { %v447_v27 = vadd.f32 %v446_v25, %v417_v26 }
 0x36e   :  { %626 = vmatmul.msk.f32.gmra.mxu3 %vm96_vm0, %v447_v27 }
 0x3d2   :  { %v480_v28 = vpop.f32.mrf.mxu3 }
 0x3d3   :  { %v492_v35 = vsel %vm96_vm0, %v480_v28, 0.0 }
 0x3da   :  { %v483_v29 = vpop.f32.mrf.mxu3 }
 0x3db   :  { %v493_v33 = vsel %vm96_vm0, %v483_v29, 0.0 }
 0x3dc   :  { %v494_v42 = vadd.f32 %v493_v33, %v492_v35 }
 0x3e9   :  { %v486_v31 = vpop.f32.mrf.mxu3 }
 0x3ea   :  { %v495_v40 = vsel %vm96_vm0, %v486_v31, 0.0 }
 0x3eb   :  { %v496_v36 = vadd.f32 %v495_v40, %v494_v42 }
 0x3f1   :  { %v489_v34 = vpop.f32.mrf.mxu3 }
 0x3f2   :  { %v497_v30 = vsel %vm96_vm0, %v489_v34, 0.0 }
 0x3f3   :  { %v498_v32 = vadd.f32 %v497_v30, %v496_v36 }
 0x3f5   :  { %v499_v44 = vrot.slane %v498_v32, 4 }
 0x3f7   :  { %v500_v45 = vadd.f32 %v499_v44, %v498_v32 }
 0x3f9   :  { %v501_v47 = vrot.slane %v500_v45, 2 }
 0x3fb   :  { %v502_v48 = vadd.f32 %v501_v47, %v500_v45 }
 0x3fd   :  { %v503_v49 = vrot.slane %v502_v48, 1 }
 0x3ff   :  { %v504_v50 = vadd.f32 %v503_v49, %v502_v48 }
 0x401   :  { %v505_v51 = vmul.f32 0.001953125, %v504_v50 }
 0x403   :  { %v506_v52 = vsub.f32 %v438_v18, %v505_v51  ;;  %v509_v53 = vsub.f32 %v447_v27, %v505_v51  ;;  %v507_v56 = vsub.f32 %v441_v21, %v505_v51  ;;  %v508_v60 = vsub.f32 %v444_v24, %v505_v51  ;;  %v449_v18 = vld [vmem:[%s1060_s4 + $0x2] sm:$0x1] }
 0x405   :  { %v510_v54 = vmul.f32 %v506_v52, %v506_v52  ;;  %v513_v55 = vmul.f32 %v509_v53, %v509_v53  ;;  %v511_v57 = vmul.f32 %v507_v56, %v507_v56  ;;  %v512_v61 = vmul.f32 %v508_v60, %v508_v60 }
 0x407   :  { %627 = vmatmul.msk.f32.vlgmr.msrb.gmra.mxu0 %vm96_vm0, %v510_v54  ;;  %630 = vmatmul.msk.f32.vlgmr.msra.gmra.mxu1 %vm96_vm0, %v513_v55 }
 0x40f   :  { %628 = vmatmul.msk.f32.gmra.mxu0 %vm96_vm0, %v511_v57 }
 0x417   :  { %629 = vmatmul.msk.f32.gmra.mxu0 %vm96_vm0, %v512_v61 }
 0x484   :  { %v543_v62 = vpop.f32.mrf.mxu0  ;;  %v552_v4 = vpop.f32.mrf.mxu1 }
 0x485   :  { %v555_v3 = vsel %vm96_vm0, %v543_v62, 0.0  ;;  %v560_v11 = vsel %vm96_vm0, %v552_v4, 0.0 }
 0x48c   :  { %v546_v63 = vpop.f32.mrf.mxu0 }
 0x48d   :  { %v556_v2 = vsel %vm96_vm0, %v546_v63, 0.0 }
 0x48e   :  { %v557_v5 = vadd.f32 %v556_v2, %v555_v3 }
 0x494   :  { %v549_v6 = vpop.f32.mrf.mxu0 }
 0x495   :  { %v558_v7 = vsel %vm96_vm0, %v549_v6, 0.0 }
 0x496   :  { %v559_v10 = vadd.f32 %v558_v7, %v557_v5 }
 0x498   :  { %v561_v12 = vadd.f32 %v560_v11, %v559_v10 }
 0x49a   :  { %v562_v13 = vrot.slane %v561_v12, 4 }
 0x49c   :  { %v563_v14 = vadd.f32 %v562_v13, %v561_v12 }
 0x49e   :  { %v564_v15 = vrot.slane %v563_v14, 2 }
 0x4a0   :  { %v565_v16 = vadd.f32 %v564_v15, %v563_v14 }
 0x4a2   :  { %v566_v37 = vrot.slane %v565_v16, 1 }
 0x4a4   :  { %v567_v38 = vadd.f32 %v566_v37, %v565_v16 }
 0x4a6   :  { %v568_v39 = vmul.f32 0.001953125, %v567_v38 }
 0x4a8   :  { %v569_v41 = vadd.f32 1e-05, %v568_v39 }
 0x4aa   :  { %644 = vrsqrt.f32 %v569_v41  ;;  %vm576_vm7 = vweird.f32 %v569_v41 }
 0x4b0   :  { %v645_v43 = vpop.eup %644 }
 0x4b1   :  { %v571_v46 = vmul.f32 %v645_v43, %v569_v41  ;;  %vm577_vm6 = vweird.f32 %v645_v43 }
 0x4b2   :  { %vm578_vm8 = vmor %vm576_vm7, %vm577_vm6 }
 0x4b3   :  { %v572_v58 = vmul.f32 %v645_v43, %v571_v46 }
 0x4b5   :  { %v573_v59 = vmul.f32 0.5, %v572_v58 }
 0x4b7   :  { %v574_v17 = vsub.f32 1.5, %v573_v59 }
 0x4b9   :  { %v575_v19 = vmul.f32 %v645_v43, %v574_v17 }
 0x4bb   :  { %v579_v20 = vsel %vm578_vm8, %v645_v43, %v575_v19 }
 0x4bc   :  { %v580_v21 = vmul.f32 %v579_v20, %v449_v18 }
 0x4be   :  { %v581_v23 = vperm.slane %v580_v21, 0 }
 0x4c0   :  { %v582_v24 = vmul.f32 %v581_v23, %v506_v52  ;;  %v583_v25 = vmul.f32 %v581_v23, %v507_v56  ;;  %v584_v26 = vmul.f32 %v581_v23, %v508_v60  ;;  %v585_v27 = vmul.f32 %v581_v23, %v509_v53 }
 0x4c2   :  { %v587_v28 = vadd.f32 %v641_v22, %v582_v24  ;;  %v588_v29 = vadd.f32 %v641_v22, %v583_v25  ;;  %v589_v31 = vadd.f32 %v641_v22, %v584_v26  ;;  %v590_v33 = vadd.f32 %v641_v22, %v585_v27 }
 0x4c4   :  { %v591_v35 = vadd.f32 %v587_v28, %v680_v0  ;;  %v592_v40 = vadd.f32 %v588_v29, %v712_v8  ;;  %v593_v42 = vadd.f32 %v589_v31, %v685_v1  ;;  %v594_v36 = vadd.f32 %v590_v33, %v717_v9 }
 0x4c6   :  { %v595_v34 = vmax.f32 %v591_v35, 0.0  ;;  %v596_v30 = vmax.f32 %v592_v40, 0.0  ;;  %v597_v32 = vmax.f32 %v593_v42, 0.0  ;;  %v598_v44 = vmax.f32 %v594_v36, 0.0 }
 0x4c8   :  { %599 = vst.msk [vmem:[%s1062_s5] sm:$0xff] %vm96_vm0, %v595_v34 }
 0x4c9   :  { %600 = vst.msk [vmem:[%s1062_s5 + $0x8] sm:$0xff] %vm96_vm0, %v596_v30 }
 0x4ca   :  { %601 = vst.msk [vmem:[%s1062_s5 + $0x10] sm:$0xff] %vm96_vm0, %v597_v32 }
 0x4cb   :  { %602 = vst.msk [vmem:[%s1062_s5 + $0x18] sm:$0xff] %vm96_vm0, %v598_v44 }

</bundles_post_ra>
